<compile_context>
chip_gen: v7x
topology: tpu7x:2x2x1
jax: 0.10.0
libtpu: 0.0.40
codegen_flags: <defaults>
</compile_context>

<pallas_src>
import numpy as np

import jax
import jax.numpy as jnp
from jax import lax
from jax.experimental import pallas as pl
from jax.experimental.pallas import tpu as pltpu


ACT_DTYPE = jnp.bfloat16        # matmul operand dtype (activations + weights)
_UNROLL_MAX_T = 16              # fully unroll short recurrences
_PARTIAL_UNROLL = 4             # partial unroll for longer recurrences
_LANE = 128
_DEFAULT_ROW_TILE = 512

# Conservative scoped-VMEM limit: fits v7x's 64 MiB/TC with headroom, plenty
# for v5e/v6e.  (Do not trust get_tpu_info capacity, it may be per-chip.)
_VMEM_LIMIT = 48 * 1024 * 1024


def _round_up(x, m):
    return (x + m - 1) // m * m


def _cparams(grid_rank):
    return pltpu.CompilerParams(
        dimension_semantics=("parallel",) * grid_rank,
        vmem_limit_bytes=_VMEM_LIMIT)


# ----------------------------------------------------------------------------
# Pallas kernels
# ----------------------------------------------------------------------------

def linear_kernel(x_ref, w_ref, b_ref, o_ref):
    """o = x @ w + b  (bf16 operands, f32 accumulate, bf16 store).  Used for the
    hoisted GRU input projection over all (t, b) rows and both directions."""
    o_ref[...] = (jnp.dot(x_ref[...], w_ref[...],
                          preferred_element_type=jnp.float32)
                  + b_ref[...]).astype(o_ref.dtype)


def head_kernel(x_ref, wp_ref, bp_ref, wq_ref, bq_ref, o_ref):
    """Fused projection + prediction head on a large lane-dense row tile:
    o = (x @ wp + bp) @ wq + bq  (bf16 operands, f32 accumulate)."""
    p = jnp.dot(x_ref[...], wp_ref[...],
                preferred_element_type=jnp.float32) + bp_ref[...]
    o_ref[...] = (jnp.dot(p.astype(wq_ref.dtype), wq_ref[...],
                          preferred_element_type=jnp.float32) + bq_ref[...])


def gru_seq_kernel(gi_ref, len_ref, whh_ref, bhh_ref, y_ref, h_scr):
    """GRU recurrence; both directions interleaved in ONE time loop.

    gi_ref:  [T, bt, ndir*3H] bf16  (hoisted x @ W_ih^T + b_ih)
    len_ref: [bt, 1] int32
    whh_ref: [ndir, H, 3H] bf16     bhh_ref: [ndir, 1, 3H] f32
    y_ref:   [T, bt, ndir*H] bf16   (fwd lanes [0:H], bwd lanes [H:2H];
                                     zeros at padded timesteps)
    h_scr:   [ndir, bt, H] f32
    """
    T = gi_ref.shape[0]
    ndir = whh_ref.shape[0]
    H = whh_ref.shape[1]
    len_col = len_ref[...]
    h_scr[...] = jnp.zeros_like(h_scr)

    # Weights/biases loaded once (VMEM-resident blocks, constant index maps).
    whh = [whh_ref[d] for d in range(ndir)]     # bf16 [H, 3H]
    bhh = [bhh_ref[d] for d in range(ndir)]     # f32  [1, 3H]

    def gru_cell(gi_bf16, h, w_t, b_hh):
        gh = jnp.dot(h.astype(w_t.dtype), w_t,
                     preferred_element_type=jnp.float32) + b_hh
        gi = gi_bf16.astype(jnp.float32)
        # PyTorch gate order: r, z, n (lane-aligned when H % 128 == 0).
        r = jax.nn.sigmoid(gi[:, 0:H] + gh[:, 0:H])
        z = jax.nn.sigmoid(gi[:, H:2 * H] + gh[:, H:2 * H])
        n = jnp.tanh(gi[:, 2 * H:3 * H] + r * gh[:, 2 * H:3 * H])
        return (1.0 - z) * n + z * h

    def step(i, carry):
        # ---- forward direction at t = i ----
        t_f = i
        m_f = t_f < len_col                               # [bt, 1] bool
        gi_f = gi_ref[t_f][:, 0:3 * H]                    # [bt, 3H] bf16
        h_f = h_scr[0]
        hn_f = gru_cell(gi_f, h_f, whh[0], bhh[0])
        h_scr[0] = jnp.where(m_f, hn_f, h_f)              # freeze past length
        y_ref[t_f, :, 0:H] = jnp.where(m_f, hn_f, 0.0).astype(y_ref.dtype)
        # ---- backward direction at t = T-1-i (interleaved; independent) ----
        if ndir == 2:
            t_b = T - 1 - i
            m_b = t_b < len_col
            gi_b = gi_ref[t_b][:, 3 * H:6 * H]
            h_b = h_scr[1]
            hn_b = gru_cell(gi_b, h_b, whh[1], bhh[1])
            h_scr[1] = jnp.where(m_b, hn_b, h_b)
            y_ref[t_b, :, H:2 * H] = jnp.where(m_b, hn_b, 0.0).astype(y_ref.dtype)
        return carry

    if T <= _UNROLL_MAX_T:
        lax.fori_loop(0, T, step, 0, unroll=True)
    else:
        lax.fori_loop(0, T, step, 0, unroll=_PARTIAL_UNROLL)


# ----------------------------------------------------------------------------
# pallas_call wrappers
# ----------------------------------------------------------------------------

def _pick_row_tile(n_rows, row_tile):
    rt = _DEFAULT_ROW_TILE if row_tile is None else row_tile
    rt = min(rt, _round_up(n_rows, 8))
    return max(8, _round_up(rt, 8))


def linear(x2d, w, b, *, row_tile=None, out_dtype=ACT_DTYPE):
    """[rows, K] @ [K, N] + [1, N], gridded over row tiles (weights resident)."""
    n_rows, k = x2d.shape
    n_cols = w.shape[1]
    rt = _pick_row_tile(n_rows, row_tile)
    n_pad = _round_up(n_rows, rt)
    if n_pad != n_rows:
        x2d = jnp.pad(x2d, ((0, n_pad - n_rows), (0, 0)))
    cost = pl.CostEstimate(
        flops=int(2 * n_pad * k * n_cols),
        transcendentals=0,
        bytes_accessed=int(n_pad * k * x2d.dtype.itemsize + k * n_cols * 2
                           + n_cols * 4 + n_pad * n_cols * 2))
    out = pl.pallas_call(
        linear_kernel,
        out_shape=jax.ShapeDtypeStruct((n_pad, n_cols), out_dtype),
        grid=(n_pad // rt,),
        in_specs=[pl.BlockSpec((rt, k), lambda r: (r, 0)),
                  pl.BlockSpec(w.shape, lambda r: (0, 0)),     # weights resident
                  pl.BlockSpec(b.shape, lambda r: (0, 0))],
        out_specs=pl.BlockSpec((rt, n_cols), lambda r: (r, 0)),
        compiler_params=_cparams(1),
        cost_estimate=cost,
    )(x2d, w, b)
    return out[:n_rows] if n_pad != n_rows else out


def head(x2d, wp, bp, wq, bq, *, row_tile=None):
    """Fused (x @ wp + bp) @ wq + bq over large row tiles; lane-dense output."""
    n_rows, h = x2d.shape
    pp = wp.shape[1]
    tp = wq.shape[1]
    rt = _pick_row_tile(n_rows, row_tile)
    n_pad = _round_up(n_rows, rt)
    if n_pad != n_rows:
        x2d = jnp.pad(x2d, ((0, n_pad - n_rows), (0, 0)))
    cost = pl.CostEstimate(
        flops=int(2 * n_pad * (h * pp + pp * tp)),
        transcendentals=0,
        bytes_accessed=int(n_pad * h * 2 + h * pp * 2 + pp * tp * 2
                           + (pp + tp) * 4 + n_pad * tp * 4))
    out = pl.pallas_call(
        head_kernel,
        out_shape=jax.ShapeDtypeStruct((n_pad, tp), jnp.float32),
        grid=(n_pad // rt,),
        in_specs=[pl.BlockSpec((rt, h), lambda r: (r, 0)),
                  pl.BlockSpec(wp.shape, lambda r: (0, 0)),
                  pl.BlockSpec(bp.shape, lambda r: (0, 0)),
                  pl.BlockSpec(wq.shape, lambda r: (0, 0)),
                  pl.BlockSpec(bq.shape, lambda r: (0, 0))],
        out_specs=pl.BlockSpec((rt, tp), lambda r: (r, 0)),
        compiler_params=_cparams(1),
        cost_estimate=cost,
    )(x2d, wp, bp, wq, bq)
    return out[:n_rows] if n_pad != n_rows else out


def gru_seq(gi, len_col, whh, bhh, *, batch_tile=None):
    """Sequential recurrence over time, gridded over batch tiles.

    On v7x pick batch_tile <= B/2 (multiple of 8) so the 'parallel' batch grid
    has >= 2 steps and both TensorCores are used."""
    T, B, C = gi.shape
    ndir, H, h3 = whh.shape
    assert C == ndir * h3
    bt = B if batch_tile is None else batch_tile
    if bt != B:
        assert bt % 8 == 0, "batch_tile must be a multiple of 8 sublanes"
    b_pad = _round_up(B, bt)
    if b_pad != B:
        # Padded rows get length 0 -> hidden stays 0 and outputs are 0.
        gi = jnp.pad(gi, ((0, 0), (0, b_pad - B), (0, 0)))
        len_col = jnp.pad(len_col, ((0, b_pad - B), (0, 0)))
    cost = pl.CostEstimate(
        flops=int(2 * T * b_pad * ndir * H * 3 * H + 12 * T * b_pad * ndir * H),
        transcendentals=int(3 * T * b_pad * ndir * H),
        bytes_accessed=int(T * b_pad * C * 2 + T * b_pad * ndir * H * 2
                           + whh.size * 2 + bhh.size * 4 + b_pad * 4))
    y = pl.pallas_call(
        gru_seq_kernel,
        out_shape=jax.ShapeDtypeStruct((T, b_pad, ndir * H), ACT_DTYPE),
        grid=(b_pad // bt,),
        in_specs=[pl.BlockSpec((T, bt, C), lambda b: (0, b, 0)),
                  pl.BlockSpec((bt, 1), lambda b: (b, 0)),
                  pl.BlockSpec(whh.shape, lambda b: (0, 0, 0)),
                  pl.BlockSpec(bhh.shape, lambda b: (0, 0, 0))],
        out_specs=pl.BlockSpec((T, bt, ndir * H), lambda b: (0, b, 0)),
        scratch_shapes=[pltpu.VMEM((ndir, bt, H), jnp.float32)],
        compiler_params=_cparams(1),
        cost_estimate=cost,
    )(gi, len_col, whh, bhh)
    return y[:, :B] if b_pad != B else y


def gru_layer(x, len_col, wih_all, bih_all, whh, bhh, *,
              batch_tile=None, row_tile=None):
    """One GRU layer (optionally bidirectional): hoisted input projection
    (one big bf16 matmul over all (t, b) rows and both directions) followed by
    the sequential recurrence.  Wrapper reshapes are free contiguous views."""
    T, B, d_in = x.shape
    gi = linear(x.reshape(T * B, d_in), wih_all, bih_all, row_tile=row_tile)
    gi = gi.reshape(T, B, gi.shape[-1])
    return gru_seq(gi, len_col, whh, bhh, batch_tile=batch_tile)


def ner_forward(prepped, inputs, lengths, *, batch_tile=None, row_tile=None):
    """inputs: [T, B] int32 token ids; lengths: decreasing host array [B]."""
    B = inputs.shape[1]
    t_eff = int(np.max(lengths))                       # pack_padded truncation
    len_col = jnp.asarray(np.asarray(lengths, dtype=np.int32).reshape(B, 1))
    # nn.Embedding lookup stays an XLA gather.
    # TODO(synk): a DMA-gather Pallas kernel (pl.ANY + make_async_copy) could
    # move the embedding lookup on-kernel; left as glue here.
    x = jnp.take(prepped["emb"], inputs, axis=0)[:t_eff].astype(ACT_DTYPE)
    # text_rnn_dropout / context_rnn_dropout / GRU inter-layer dropout: identity (eval).
    for wih, bih, whh, bhh in prepped["text_rnn"]:
        x = gru_layer(x, len_col, wih, bih, whh, bhh,
                      batch_tile=batch_tile, row_tile=row_tile)
    for wih, bih, whh, bhh in prepped["context_rnn"]:
        x = gru_layer(x, len_col, wih, bih, whh, bhh,
                      batch_tile=batch_tile, row_tile=row_tile)
    T, Bc, Hd = x.shape
    # Batched head: two large MXU-friendly matmuls over all rows (padded rows
    # are exactly zero in bf16, so they get bias-only outputs like PyTorch).
    out = head(x.reshape(T * Bc, Hd),
               prepped["proj_w"], prepped["proj_b"],
               prepped["pred_w"], prepped["pred_b"], row_tile=row_tile)
    return out[:, :prepped["n_tags"]]                  # drop lane padding


# ----------------------------------------------------------------------------
# Parameter init (PyTorch-style layout) + one-time prep (transpose / cast / pad)
# ----------------------------------------------------------------------------

def _uniform(key, shape, scale):
    return jax.random.uniform(key, shape, jnp.float32, -scale, scale)


def init_gru(key, input_size, hidden, num_layers, bidirectional):
    dirs = ["fwd", "bwd"] if bidirectional else ["fwd"]
    scale = 1.0 / np.sqrt(hidden)
    layers = []
    for l in range(num_layers):
        in_sz = input_size if l == 0 else hidden * len(dirs)
        layer = {}
        for name in dirs:
            key, k1, k2, k3, k4 = jax.random.split(key, 5)
            layer[name] = (
                _uniform(k1, (3 * hidden, in_sz), scale),   # weight_ih
                _uniform(k2, (3 * hidden, hidden), scale),  # weight_hh
                _uniform(k3, (3 * hidden,), scale),         # bias_ih
                _uniform(k4, (3 * hidden,), scale),         # bias_hh
            )
        layers.append(layer)
    return key, layers


def init_params(key, text_vocab, tags_vocab, emb_dim, hidden, proj_dim,
                bidirectional, text_layers, context_layers):
    key, k_emb = jax.random.split(key)
    params = {"emb": jax.random.normal(k_emb, (text_vocab, emb_dim), jnp.float32)}
    key, params["text_rnn"] = init_gru(key, emb_dim, hidden, text_layers,
                                       bidirectional)
    ctx_in = hidden * (2 if bidirectional else 1)
    key, params["context_rnn"] = init_gru(key, ctx_in, hidden, context_layers,
                                          False)
    key, k1, k2, k3, k4 = jax.random.split(key, 5)
    s_p = 1.0 / np.sqrt(hidden)
    s_q = 1.0 / np.sqrt(proj_dim)
    params["proj_w"] = _uniform(k1, (proj_dim, hidden), s_p)
    params["proj_b"] = _uniform(k2, (proj_dim,), s_p)
    params["pred_w"] = _uniform(k3, (tags_vocab, proj_dim), s_q)
    params["pred_b"] = _uniform(k4, (tags_vocab,), s_q)
    return params


def prepare_params(params, bidirectional):
    """One-time transpose / bf16 cast / per-direction stacking / head padding."""
    def prep_gru(layers, dirs):
        out = []
        for layer in layers:
            wih = jnp.concatenate([layer[d][0].T for d in dirs],
                                  axis=1).astype(ACT_DTYPE)        # [Din, ndir*3H]
            bih = jnp.concatenate([layer[d][2] for d in dirs],
                                  axis=0).reshape(1, -1)           # [1, ndir*3H] f32
            whh = jnp.stack([layer[d][1].T for d in dirs],
                            axis=0).astype(ACT_DTYPE)              # [ndir, H, 3H]
            bhh = jnp.stack([layer[d][3].reshape(1, -1) for d in dirs],
                            axis=0)                                # [ndir, 1, 3H] f32
            out.append((wih, bih, whh, bhh))
        return out

    dirs = ["fwd", "bwd"] if bidirectional else ["fwd"]
    proj_dim, hidden = params["proj_w"].shape
    tags = params["pred_w"].shape[0]
    pp = _round_up(proj_dim, _LANE)          # lane-dense intermediate
    tp = _round_up(tags, _LANE)              # lane-dense (unmasked) output stores
    proj_w = jnp.zeros((hidden, pp), jnp.float32)
    proj_w = proj_w.at[:, :proj_dim].set(params["proj_w"].T).astype(ACT_DTYPE)
    proj_b = jnp.zeros((1, pp), jnp.float32).at[0, :proj_dim].set(params["proj_b"])
    pred_w = jnp.zeros((pp, tp), jnp.float32)
    pred_w = pred_w.at[:proj_dim, :tags].set(params["pred_w"].T).astype(ACT_DTYPE)
    pred_b = jnp.zeros((1, tp), jnp.float32).at[0, :tags].set(params["pred_b"])
    return {
        "emb": params["emb"],
        "text_rnn": prep_gru(params["text_rnn"], dirs),
        "context_rnn": prep_gru(params["context_rnn"], ["fwd"]),
        "proj_w": proj_w, "proj_b": proj_b,
        "pred_w": pred_w, "pred_b": pred_b,
        "n_tags": tags,
    }


# ----------------------------------------------------------------------------
# Pure-JAX reference (same math / same bf16 casts as the kernels, no Pallas)
# ----------------------------------------------------------------------------

def _ref_gru_layer(x, lengths, layer, dirs):
    T, B, d_in = x.shape
    outs = []
    for di, name in enumerate(dirs):
        w_ih, w_hh, b_ih, b_hh = layer[name]
        H = w_hh.shape[1]
        wih_t = w_ih.T.astype(ACT_DTYPE)
        whh_t = w_hh.T.astype(ACT_DTYPE)
        gi_all = (jnp.dot(x.reshape(T * B, d_in), wih_t,
                          preferred_element_type=jnp.float32)
                  + b_ih).astype(ACT_DTYPE).reshape(T, B, 3 * H)   # bf16 like kernel
        h = jnp.zeros((B, H), jnp.float32)
        ys = [None] * T
        order = range(T) if di == 0 else range(T - 1, -1, -1)
        for t in order:
            m = (t < lengths)[:, None]
            gi = gi_all[t].astype(jnp.float32)
            gh = jnp.dot(h.astype(ACT_DTYPE), whh_t,
                         preferred_element_type=jnp.float32) + b_hh
            r = jax.nn.sigmoid(gi[:, :H] + gh[:, :H])
            z = jax.nn.sigmoid(gi[:, H:2 * H] + gh[:, H:2 * H])
            n = jnp.tanh(gi[:, 2 * H:] + r * gh[:, 2 * H:])
            h_new = (1.0 - z) * n + z * h
            h = jnp.where(m, h_new, h)
            ys[t] = jnp.where(m, h_new, 0.0).astype(ACT_DTYPE)
        outs.append(jnp.stack(ys))
    return outs[0] if len(outs) == 1 else jnp.concatenate(outs, axis=-1)


def ref_forward(params, inputs, lengths, *, bidirectional):
    t_eff = int(np.max(lengths))
    lens = jnp.asarray(np.asarray(lengths, dtype=np.int32))
    x = jnp.take(params["emb"], inputs, axis=0)[:t_eff].astype(ACT_DTYPE)
    dirs = ["fwd", "bwd"] if bidirectional else ["fwd"]
    for layer in params["text_rnn"]:
        x = _ref_gru_layer(x, lens, layer, dirs)
    for layer in params["context_rnn"]:
        x = _ref_gru_layer(x, lens, layer, ["fwd"])
    y2d = x.reshape(-1, x.shape[-1])
    p = jnp.dot(y2d, params["proj_w"].T.astype(ACT_DTYPE),
                preferred_element_type=jnp.float32) + params["proj_b"]
    return jnp.dot(p.astype(ACT_DTYPE), params["pred_w"].T.astype(ACT_DTYPE),
                   preferred_element_type=jnp.float32) + params["pred_b"]


# ----------------------------------------------------------------------------

if __name__ == "__main__":
    T, B = 8, 4
    TEXT_VOCAB, TAGS_VOCAB = 50, 9
    EMB_DIM, HIDDEN_DIM, PROJ_DIM = 32, 32, 16
    BIDIRECTIONAL = True
    TEXT_LAYERS, CONTEXT_LAYERS = 2, 1

    key = jax.random.PRNGKey(0)
    params = init_params(key, TEXT_VOCAB, TAGS_VOCAB, EMB_DIM, HIDDEN_DIM,
                         PROJ_DIM, BIDIRECTIONAL, TEXT_LAYERS, CONTEXT_LAYERS)
    prepped = prepare_params(params, BIDIRECTIONAL)

    key, k_in = jax.random.split(jax.random.PRNGKey(0))
    inputs = jax.random.randint(k_in, (T, B), 0, TEXT_VOCAB, dtype=jnp.int32)
    lengths = np.array([8, 7, 5, 3], dtype=np.int32)   # decreasing order

    out = ner_forward(prepped, inputs, lengths)
    out = jax.block_until_ready(out)

    assert out.shape == (int(np.max(lengths)) * B, TAGS_VOCAB), out.shape

    ref = ref_forward(params, inputs, lengths, bidirectional=BIDIRECTIONAL)
    np.testing.assert_allclose(np.asarray(out), np.asarray(ref),
                               atol=2e-2, rtol=2e-2)

    print("KERNEL_OK")
</pallas_src>

<mosaic_0001>
module attributes {stable_mosaic.version = 11 : i64} {
  func.func @linear_kernel(%arg0: i32, %arg1: memref<32x32xbf16, #tpu.memory_space<vmem>>, %arg2: memref<32x192xbf16, #tpu.memory_space<vmem>>, %arg3: memref<1x192xf32, #tpu.memory_space<vmem>>, %arg4: memref<32x192xbf16, #tpu.memory_space<vmem>>) attributes {dimension_semantics = [#tpu.dimension_semantics<parallel>], iteration_bounds = array<i64: 1>, scalar_prefetch = 0 : i64, scratch_operands = 0 : i64, tpu.core_type = #tpu.core_type<tc>, window_params = [{transform_indices = @transform_0, window_bounds = array<i64: 32, 32>}, {pipeline_mode = #tpu.pipeline_mode<synchronous>, transform_indices = @transform_1, window_bounds = array<i64: 32, 192>}, {pipeline_mode = #tpu.pipeline_mode<synchronous>, transform_indices = @transform_2, window_bounds = array<i64: 1, 192>}, {transform_indices = @transform_3, window_bounds = array<i64: 32, 192>}]} {
    %c0 = arith.constant 0 : index
    %c0_0 = arith.constant 0 : index
    %0 = vector.load %arg1[%c0, %c0_0] : memref<32x32xbf16, #tpu.memory_space<vmem>>, vector<32x32xbf16>
    %c0_1 = arith.constant 0 : index
    %c0_2 = arith.constant 0 : index
    %1 = vector.load %arg2[%c0_1, %c0_2] : memref<32x192xbf16, #tpu.memory_space<vmem>>, vector<32x192xbf16>
    %cst = arith.constant dense<0.000000e+00> : vector<32x192xf32>
    %2 = tpu.matmul %0, %1, %cst {dimension_numbers = #tpu.dot_dimension_numbers<[1], [0], [0], [1], [0, 0, 1, 1], [], []>} : vector<32x32xbf16>, vector<32x192xbf16>, vector<32x192xf32> -> vector<32x192xf32>
    %c0_3 = arith.constant 0 : index
    %c0_4 = arith.constant 0 : index
    %3 = vector.load %arg3[%c0_3, %c0_4] : memref<1x192xf32, #tpu.memory_space<vmem>>, vector<1x192xf32>
    %4 = vector.broadcast %3 : vector<1x192xf32> to vector<32x192xf32>
    %5 = arith.addf %2, %4 : vector<32x192xf32>
    %6 = arith.truncf %5 : vector<32x192xf32> to vector<32x192xbf16>
    %c0_5 = arith.constant 0 : index
    %c0_6 = arith.constant 0 : index
    %7 = vector.load %arg4[%c0_5, %c0_6] : memref<32x192xbf16, #tpu.memory_space<vmem>>, vector<32x192xbf16>
    tpu.vector_store %arg4[%c0_5, %c0_6], %6 {strides = array<i32>} : memref<32x192xbf16, #tpu.memory_space<vmem>>, vector<32x192xbf16>,
    return
  }
  func.func @transform_0(%arg0: i32) -> (i32, i32) {
    %c0_i32 = arith.constant 0 : i32
    %c0_i32_0 = arith.constant 0 : i32
    return %arg0, %c0_i32 : i32, i32
  }
  func.func @transform_1(%arg0: i32) -> (i32, i32) {
    %c0_i32 = arith.constant 0 : i32
    %c0_i32_0 = arith.constant 0 : i32
    %c0_i32_1 = arith.constant 0 : i32
    return %c0_i32, %c0_i32_0 : i32, i32
  }
  func.func @transform_2(%arg0: i32) -> (i32, i32) {
    %c0_i32 = arith.constant 0 : i32
    %c0_i32_0 = arith.constant 0 : i32
    %c0_i32_1 = arith.constant 0 : i32
    return %c0_i32, %c0_i32_0 : i32, i32
  }
  func.func @transform_3(%arg0: i32) -> (i32, i32) {
    %c0_i32 = arith.constant 0 : i32
    %c0_i32_0 = arith.constant 0 : i32
    return %arg0, %c0_i32 : i32, i32
  }
}

</mosaic_0001>

<bundles_post_ra>
// kernel: tpu_custom_call.1
= control target key start
LH: loop header
LB: loop body
LE: loop exit
PB: predicated region body
PF: predicated region fallthrough
CT: control target
= control target key end

     0   :  { %8 = vsyncpa [#allocation3], 0  ;;  %s396_s0 = inlined_call_operand.hbm [shape: bf16[32,32], index: 0, kind: input, shape index: {}]   ;;  %s397_s1 = inlined_call_operand.hbm [shape: bf16[32,192], index: 1, kind: input, shape index: {}]   ;;  %s398_s2 = inlined_call_operand.vmem [shape: f32[1,192], index: 2, kind: input, shape index: {}]   ;;  %s399_s3 = inlined_call_operand.hbm [shape: bf16[32,192], index: 3, kind: output, shape index: {}]  }
   0x1   :  { %9 = vsyncpa [#allocation6], 0 }
   0x2   :  { %10 = vsyncpa [#allocation4], 0  ;;  %s311_s12 = smov [#allocation2]   ;;  %s239_s16 = scalar_lea.hbm %s396_s0, 256 }
   0x3   :  { %s16_s13 = sshll.u32 %s311_s12, 4  ;;  %p240_p0 = scmp.ne.s32.totalorder %s396_s0, %s239_s16  ;;  %s17_s13 = int_to_ptr.vmem [resolvable:$true] %s16_s13 }
   0x4   :  { %p243_p1 = scmp.lt.u32.totalorder %s239_s16, %s396_s0 }
   0x6   :  { %p245_p2 = pnand %p243_p1, %p240_p0 }
   0x8   :  { %248 = shalt.err (!%p245_p2)
}
   0x9   :  { %s249_s21 = scalar_lea.vmem %s17_s13, 256  ;;  %p254_p4 = scmp.lt.s32.totalorder %s17_s13, %s17_s13 }
   0xa   :  { %p250_p3 = scmp.ne.s32.totalorder %s17_s13, %s249_s21  ;;  %p255_p5 = scmp.lt.s32.totalorder %s249_s21, %s249_s21 }
   0xc   :  { %p256_p6 = por %p255_p5, %p254_p4 }
   0xe   :  { %p257_p7 = pnand %p256_p6, %p250_p3 }
  0x10   :  { %260 = shalt.err (!%p257_p7)
}
  0x11   :  { %s312_s22 = smov 64   ;;  %s313_s23 = smov 4  }
  0x12   :  { %22 = dma.hbm_to_vmem [thread:$0]  %s396_s0, 256, %s17_s13, [#allocation3], %s312_s22, %s312_s22, %s313_s23  }
  0x13   :  { %s314_s26 = smov [#allocation5]   ;;  %s261_s30 = scalar_lea.hbm %s397_s1, 512 }
  0x14   :  { %s28_s27 = sshll.u32 %s314_s26, 4  ;;  %p262_p8 = scmp.ne.s32.totalorder %s397_s1, %s261_s30  ;;  %s29_s27 = int_to_ptr.vmem [resolvable:$true] %s28_s27 }
  0x15   :  { %p265_p9 = scmp.lt.u32.totalorder %s261_s30, %s397_s1 }
  0x17   :  { %p267_p10 = pnand %p265_p9, %p262_p8 }
  0x19   :  { %270 = shalt.err (!%p267_p10)
}
  0x1a   :  { %s271_s8 = scalar_lea.vmem %s29_s27, 512  ;;  %p276_p12 = scmp.lt.s32.totalorder %s29_s27, %s29_s27 }
  0x1b   :  { %p272_p11 = scmp.ne.s32.totalorder %s29_s27, %s271_s8  ;;  %p277_p13 = scmp.lt.s32.totalorder %s271_s8, %s271_s8 }
  0x1d   :  { %p278_p0 = por %p277_p13, %p276_p12 }
  0x1f   :  { %p279_p1 = pnand %p278_p0, %p272_p11 }
  0x21   :  { %282 = shalt.err (!%p279_p1)
}
  0x22   :  { %s315_s0 = smov 128   ;;  %s316_s9 = smov 8  }
  0x23   :  { %34 = dma.hbm_to_vmem [thread:$0]  %s397_s1, 512, %s29_s27, [#allocation6], %s315_s0, %s315_s0, %s316_s9  }
  0x24   :  { %305 = dma.done.wait [#allocation3], 256  }
  0x25   :  { %306 = vsyncadd [#allocation3], 4294967040 }
  0x26   :  { %307 = dma.done.wait [#allocation6], 512  }
  0x27   :  { %308 = vsyncadd [#allocation6], 4294966784  ;;  %v317_v0 = vmov 0   ;;  %v231_v1 = vld [vmem:[#allocation5 + $0x4] ss:$8 sps:$4 sm:$0xff]   ;;  %v237_v5 = vld [vmem:[#allocation2] sm:$0xff]   ;;  %v54_v7 = vlaneseq }
  0x28   :  { %133 = vmatprep.mubr.bf16.mxu0 %v317_v0  ;;  %143 = vmatprep.mubr.bf16.mxu1 %v317_v0  ;;  %v233_v2 = vld [vmem:[#allocation5] ss:$8 sps:$4 sm:$0xff]   ;;  %v234_v3 = vld [vmem:[#allocation5 + $0x14] ss:$8 sps:$4 sm:$0xff]   ;;  %v236_v4 = vld [vmem:[#allocation5 + $0x10] ss:$8 sps:$4 sm:$0xff]  }
  0x29   :  { %101 = vmatprep.subr.bf16.mxu0 %v231_v1  ;;  %219 = vmatprep.subr.bf16.mxu1 %v231_v1  ;;  %v238_v6 = vld [vmem:[#allocation2 + $0x8] sm:$0xff]   ;;  %vm94_vm0 = vcmask 261120   ;;  %v55_v8 = vshrl.u32 %v54_v7, 7  ;;  %v52_v10 = vld [vmem:[%s398_s2] sm:$0x3]  ;;  %vm178_vm1 = vcmask 1043456  }
  0x2a   :  { %102 = vmatpush1.bf16.msra.mxu0 %v233_v2  ;;  %221 = vmatpush1.bf16.msra.mxu1 %v233_v2  ;;  %vm179_vm2 = vcmask 523268   ;;  %s318_s2 = smov [#allocation7]  }
  0x2b   :  { %103 = vmatprep.subr.bf16.mxu0 %v234_v3  ;;  %220 = vmatprep.subr.bf16.mxu1 %v234_v3  ;;  %v56_v9 = vsub.s32 0, %v55_v8  ;;  %v60_v11 = vsub.s32 1, %v55_v8  ;;  %vm369_vm3 = vmor %vm179_vm2, %vm178_vm1  ;;  %s190_s13 = sshll.u32 %s318_s2, 4  ;;  %s191_s13 = int_to_ptr.vmem [resolvable:$true] %s190_s13 }
  0x2c   :  { %s283_s14 = scalar_lea.vmem %s191_s13, 512  ;;  %p288_p3 = scmp.lt.s32.totalorder %s191_s13, %s191_s13 }
  0x2d   :  { %v57_v12 = vrot.slane %v52_v10, %v56_v9  ;;  %v61_v13 = vrot.slane %v52_v10, %v60_v11  ;;  %p284_p2 = scmp.ne.s32.totalorder %s191_s13, %s283_s14  ;;  %p289_p4 = scmp.lt.s32.totalorder %s283_s14, %s283_s14 }
  0x2e   :  { %104 = vmatpush1.bf16.msra.mxu0 %v236_v4  ;;  %222 = vmatpush1.bf16.msra.mxu1 %v236_v4 }
  0x2f   :  { %p290_p5 = por %p289_p4, %p288_p3 }
  0x31   :  { %209 = vmatmul.mubr.msk.bf16.vlgmr.msra.gmra.mrb[0].mxu0 %vm94_vm0, %v237_v5  ;;  %210 = vmatmul.mubr.msk.bf16.vlgmr.msra.gmra.mrb[0].mxu1 %vm94_vm0, %v238_v6  ;;  %p291_p6 = pnand %p290_p5, %p284_p2 }
 0x104   :  { %v135_v14 = vpop.f32.mrb[0].mxu0  ;;  %v145_v15 = vpop.f32.mrb[0].mxu1 }
 0x105   :  { %v136_v16 = vadd.f32 %v135_v14, %v57_v12  ;;  %v146_v17 = vadd.f32 %v145_v15, %v57_v12  ;;  %v137_v18 = vpop.f32.mrb[1].mxu0  ;;  %v147_v19 = vpop.f32.mrb[1].mxu1 }
 0x106   :  { %v138_v20 = vadd.f32 %v137_v18, %v61_v13  ;;  %v148_v21 = vadd.f32 %v147_v19, %v61_v13  ;;  %v139_v22 = vpop.f32.mrb[2].mxu0  ;;  %v149_v23 = vpop.f32.mrb[2].mxu1 }
 0x107   :  { %v140_v25 = vadd.f32 %v139_v22, %v57_v12  ;;  %v150_v26 = vadd.f32 %v149_v23, %v57_v12  ;;  %v141_v27 = vpop.f32.mrb[3].mxu0  ;;  %v151_v28 = vpop.f32.mrb[3].mxu1 }
 0x108   :  { %v215_v29 = vpack.c.bf16 %v138_v20, %v136_v16  ;;  %v217_v30 = vpack.c.bf16 %v148_v21, %v146_v17  ;;  %v142_v31 = vadd.f32 %v141_v27, %v61_v13  ;;  %v152_v32 = vadd.f32 %v151_v28, %v61_v13 }
 0x10a   :  { %181 = vst.msk [vmem:[#allocation7] sm:$0xff] %vm369_vm3, %v215_v29  ;;  %183 = vst.msk [vmem:[#allocation7 + $0x10] sm:$0xff] %vm369_vm3, %v217_v30  ;;  %v216_v33 = vpack.c.bf16 %v142_v31, %v140_v25  ;;  %v218_v34 = vpack.c.bf16 %v152_v32, %v150_v26 }
 0x10c   :  { %182 = vst.msk [vmem:[#allocation7 + $0x8] sm:$0xff] %vm369_vm3, %v216_v33  ;;  %184 = vst.msk [vmem:[#allocation7 + $0x18] sm:$0xff] %vm369_vm3, %v218_v34 }
 0x10d   :  { %294 = shalt.err (!%p291_p6)
}
 0x10e   :  { %s295_s17 = scalar_lea.hbm %s399_s3, 512 }
 0x10f   :  { %p296_p7 = scmp.ne.s32.totalorder %s399_s3, %s295_s17  ;;  %p299_p8 = scmp.lt.u32.totalorder %s295_s17, %s399_s3 }
 0x111   :  { %p301_p9 = pnand %p299_p8, %p296_p7 }
 0x113   :  { %304 = shalt.err (!%p301_p9)
}
 0x114   :  { %196 = dma.vmem_to_hbm [thread:$0]  %s191_s13, 512, %s399_s3, [#allocation4], %s315_s0, %s315_s0, %s316_s9  }
 0x115   :  { %309 = dma.done.wait [#allocation4], 512  }
 0x116   :  { %310 = vsyncadd [#allocation4], 4294966784 }
 0x117   :  { %200 = vsyncpa [#allocation3], 1 }
 0x118   :  { %201 = vsyncpa [#allocation6], 1 }
 0x119   :  { %202 = vsyncpa [#allocation4], 1 }

</bundles_post_ra>
